<compile_context>
chip_gen: v5e
topology: v5e:2x2
jax: 0.10.0
libtpu: 0.0.40
codegen_flags: <defaults>
</compile_context>

<pallas_src>
import functools

import jax
import jax.numpy as jnp
from jax.experimental import pallas as pl
from jax.experimental.pallas import tpu as pltpu


def _round_up(x, m):
    return ((x + m - 1) // m) * m


# --------------------------- spatial mean kernel -----------------------------

def _spatial_mean_kernel(x_ref, o_ref, *, inv_s):
    # x:(R_tile, S_tile) -> accumulate row sums into o:(R_tile, 1);
    # scale by 1/S on the last spatial step.
    j = pl.program_id(1)

    @pl.when(j == 0)
    def _():
        o_ref[...] = jnp.zeros_like(o_ref)

    o_ref[...] += jnp.sum(x_ref[...], axis=1, keepdims=True)

    @pl.when(j == pl.num_programs(1) - 1)
    def _():
        o_ref[...] = o_ref[...] * inv_s


def spatial_mean(x, *, r_tile=256, s_tile=2048):
    """NCHW (B,C,H,W) -> (B,C) mean over spatial dims, tiled Pallas reduction."""
    B, C, H, W = x.shape
    R, S = B * C, H * W
    x2 = x.reshape(R, S).astype(jnp.float32)

    rt = min(r_tile, _round_up(R, 8))      # row tile (multiple of 8)
    st = min(s_tile, _round_up(S, 128))    # spatial tile (multiple of 128)
    Rp, Sp = _round_up(R, rt), _round_up(S, st)
    if (Rp, Sp) != (R, S):
        # zero padding is exact for a sum; we divide by the true S below.
        x2 = jnp.pad(x2, ((0, Rp - R), (0, Sp - S)))

    out = pl.pallas_call(
        functools.partial(_spatial_mean_kernel, inv_s=1.0 / S),
        grid=(Rp // rt, Sp // st),
        in_specs=[pl.BlockSpec((rt, st), lambda i, j: (i, j))],
        out_specs=pl.BlockSpec((rt, 1), lambda i, j: (i, 0)),
        out_shape=jax.ShapeDtypeStruct((Rp, 1), jnp.float32),
        compiler_params=pltpu.CompilerParams(
            dimension_semantics=("parallel", "arbitrary"),
            vmem_limit_bytes=32 * 1024 * 1024,   # explicit: safe on v5e..v7x
        ),
    )(x2)
    return out[:R, 0].reshape(B, C)


# --------------------------- fused detector kernel ---------------------------

def _make_fused_kernel(num_layers, num_classes, magnitude):
    """Fused: features -> maha scores -> class pick -> perturb -> re-score ->
    max -> regressor -> sigmoid.  Everything stays in VMEM/vregs."""

    def kernel(*refs):
        xbar_ref, inv_std_ref, reg_wt_ref, reg_b_ref = refs[:4]
        layer_refs = refs[4:4 + 7 * num_layers]
        scores_ref, proba_ref = refs[4 + 7 * num_layers:]

        xbar = xbar_ref[...]                         # (B, C_in)
        inv_std = inv_std_ref[...]                   # (1, C_in)
        B = xbar.shape[0]
        L = num_layers

        feats = jnp.zeros((B, L), jnp.float32)
        col_L = jax.lax.broadcasted_iota(jnp.int32, (B, L), 1)

        for l in range(L):
            (wt_ref, b_ref, mu_ref, p_ref, pmut_ref, qmu_ref, g_ref) = \
                layer_refs[7 * l:7 * (l + 1)]
            wt = wt_ref[...]          # (C_in, D)   = W^T
            bias = b_ref[...]         # (1, D)
            mu = mu_ref[...]          # (C, D)
            P = p_ref[...]            # (D, D)      symmetric precision
            PmuT = pmut_ref[...]      # (D, C)      = P @ mu^T   (precomputed)
            q_mu = qmu_ref[...]       # (1, C)      = diag(mu P mu^T)
            G = g_ref[...]            # (D, C_in)   = Psym @ W   (precomputed)

            def maha(feat):
                # -0.5 (feat - mu_c) P (feat - mu_c)^T, two MXU matmuls total.
                featP = jnp.dot(feat, P, preferred_element_type=jnp.float32)
                q_feat = jnp.sum(featP * feat, axis=1, keepdims=True)   # (B,1)
                cross = jnp.dot(feat, PmuT,
                                preferred_element_type=jnp.float32)     # (B,C)
                return cross - 0.5 * (q_feat + q_mu)

            # synthetic backbone: spatial-mean feature = xbar @ W^T + b
            out = jnp.dot(xbar, wt, preferred_element_type=jnp.float32) + bias
            gauss = maha(out)                                           # (B,C)

            # in-kernel class selection: first-argmax one-hot, then MXU gather
            m = jnp.max(gauss, axis=1, keepdims=True)
            col_c = jax.lax.broadcasted_iota(
                jnp.int32, gauss.shape, 1).astype(jnp.float32)
            masked = jnp.where(gauss >= m, col_c, float(num_classes))
            pred = jnp.min(masked, axis=1, keepdims=True)               # (B,1)
            onehot = (col_c == pred).astype(jnp.float32)                # (B,C)
            batch_mean = jnp.dot(onehot, mu,
                                 preferred_element_type=jnp.float32)    # (B,D)
            z = out - batch_mean

            # closed-form FGSM perturbation of the spatial-mean feature:
            # grad_x is spatially constant, sign(grad_x) = sign(z @ Psym @ W)
            g_chan = jnp.dot(z, G, preferred_element_type=jnp.float32)  # (B,C_in)
            sign = jnp.where(g_chan >= 0.0, 1.0, -1.0)
            delta = magnitude * jnp.dot(sign * inv_std, wt,
                                        preferred_element_type=jnp.float32)
            noise_gauss = maha(out - delta)                             # (B,C)
            layer_score = jnp.max(noise_gauss, axis=1, keepdims=True)   # (B,1)
            feats = feats + jnp.where(col_L == l, layer_score, 0.0)

        scores_ref[...] = feats                                         # (B,L)
        logits = jnp.dot(feats, reg_wt_ref[...],
                         preferred_element_type=jnp.float32) + reg_b_ref[...]
        proba_ref[...] = jax.nn.sigmoid(logits)                         # (B,1)

    return kernel


# ---------------------------------- detector ---------------------------------

class MahalanobisDetectorPallas:
    """Mirrors MahalanobisDetector.forward with deterministic synthetic params.

    Synthetic backbone: intermediate_forward(x, l) == 1x1 conv with
    weight W[l]:(D_l, C_in), bias b[l]:(D_l,)  (so spatial-mean of features
    equals  spatial_mean(x) @ W[l]^T + b[l]).
    """

    def __init__(self, key, *, num_classes, layer_dims, in_channels, dataset_std):
        self.num_classes = num_classes
        self.layer_dims = list(layer_dims)
        self.in_channels = in_channels
        std = jnp.asarray(dataset_std, jnp.float32)
        self.inv_std = (1.0 / std).reshape(1, in_channels)

        L = len(layer_dims)
        keys = jax.random.split(key, 4 * L + 2)
        self.Wt, self.bias, self.mu = [], [], []
        self.P, self.PmuT, self.q_mu, self.G = [], [], [], []
        for l, d in enumerate(self.layer_dims):
            kw, kb, km, kp = keys[4 * l:4 * l + 4]
            W = jax.random.normal(kw, (d, in_channels), jnp.float32) * 0.1
            b = jax.random.normal(kb, (d,), jnp.float32) * 0.01
            mu = jax.random.normal(km, (num_classes, d), jnp.float32) * 0.5
            A = jax.random.normal(kp, (d, d), jnp.float32)
            # symmetric positive-definite precision (as an inverse covariance is)
            P = A @ A.T / d + jnp.eye(d, dtype=jnp.float32)
            Psym = 0.5 * (P + P.T)
            # precomputed constants (hoisted out of the forward path)
            self.Wt.append(jnp.transpose(W))                       # (C_in, D)
            self.bias.append(b.reshape(1, d))                      # (1, D)
            self.mu.append(mu)                                     # (C, D)
            self.P.append(P)                                       # (D, D)
            self.PmuT.append(P @ jnp.transpose(mu))                # (D, C)
            self.q_mu.append(jnp.sum((mu @ P) * mu, axis=1)
                             .reshape(1, num_classes))             # (1, C)
            self.G.append(Psym @ W)                                # (D, C_in)

        # regressor: Linear(L -> 1)
        reg_w = jax.random.normal(keys[-2], (1, L), jnp.float32) * 0.3
        reg_b = jax.random.normal(keys[-1], (1,), jnp.float32) * 0.1
        self.reg_wt = jnp.transpose(reg_w)                         # (L, 1)
        self.reg_b = reg_b.reshape(1, 1)

    # ---- fused per-layer pipeline + regressor in ONE pallas_call ------------
    def _fused(self, xbar, magnitude):
        B = xbar.shape[0]
        L = len(self.layer_dims)
        C, Cin = self.num_classes, self.in_channels

        args = [xbar.astype(jnp.float32), self.inv_std, self.reg_wt, self.reg_b]
        for l in range(L):
            args += [self.Wt[l], self.bias[l], self.mu[l], self.P[l],
                     self.PmuT[l], self.q_mu[l], self.G[l]]

        flops = 0
        bytes_accessed = 4 * (B * Cin + Cin + L + 1 + B * L + B)
        for d in self.layer_dims:
            flops += 2 * B * (Cin * d + 2 * (d * d + d * C) + C * d
                              + d * Cin + Cin * d)
            bytes_accessed += 4 * (Cin * d + d + C * d + d * d + d * C + C
                                   + d * Cin)
        flops += 2 * B * L

        kernel = _make_fused_kernel(L, self.num_classes, magnitude)
        scores, proba = pl.pallas_call(
            kernel,
            out_shape=(jax.ShapeDtypeStruct((B, L), jnp.float32),
                       jax.ShapeDtypeStruct((B, 1), jnp.float32)),
            cost_estimate=pl.CostEstimate(flops=int(flops),
                                          transcendentals=int(B),
                                          bytes_accessed=int(bytes_accessed)),
        )(*args)
        return scores, proba

    def mahalanobis_score(self, x, magnitude=0.001):
        xbar = spatial_mean(x)                       # (B, C_in), tiled reduction
        scores, _ = self._fused(xbar, magnitude)
        return scores                                # (B, L)

    def forward(self, x, magnitude=0.001):
        xbar = spatial_mean(x)                       # only pass over the image
        _, proba = self._fused(xbar, magnitude)
        return proba[:, 0]                           # (B,)


# TODO(synk): .fit() (sample_estimator) and .train_regressor() (sklearn
# LogisticRegressionCV) are training-time utilities, not part of forward;
# their outputs (sample_mean, precision, regressor weights) are synthesized
# deterministically above.

if __name__ == "__main__":
    key = jax.random.PRNGKey(0)
    kparam, kx = jax.random.split(key)
    det = MahalanobisDetectorPallas(
        kparam,
        num_classes=10,
        layer_dims=[32, 64],
        in_channels=3,
        dataset_std=[0.2470, 0.2435, 0.2616],   # CIFAR std
    )
    x = jax.random.normal(kx, (2, 3, 32, 32), jnp.float32)   # NCHW, like PyTorch
    proba = jax.jit(det.forward)(x)
    proba = jax.block_until_ready(proba)
    assert proba.shape == (2,)
    assert bool(jnp.all(jnp.isfinite(proba)))
    scores = jax.block_until_ready(jax.jit(det.mahalanobis_score)(x))
    assert scores.shape == (2, 2)
    assert bool(jnp.all(jnp.isfinite(scores)))
    print("KERNEL_OK")
</pallas_src>

<mosaic_0001>
module attributes {stable_mosaic.version = 11 : i64} {
  func.func @kernel(%arg0: memref<2x3xf32, #tpu.memory_space<vmem>>, %arg1: memref<1x3xf32, #tpu.memory_space<vmem>>, %arg2: memref<2x1xf32, #tpu.memory_space<vmem>>, %arg3: memref<1x1xf32, #tpu.memory_space<vmem>>, %arg4: memref<3x32xf32, #tpu.memory_space<vmem>>, %arg5: memref<1x32xf32, #tpu.memory_space<vmem>>, %arg6: memref<10x32xf32, #tpu.memory_space<vmem>>, %arg7: memref<32x32xf32, #tpu.memory_space<vmem>>, %arg8: memref<32x10xf32, #tpu.memory_space<vmem>>, %arg9: memref<1x10xf32, #tpu.memory_space<vmem>>, %arg10: memref<32x3xf32, #tpu.memory_space<vmem>>, %arg11: memref<3x64xf32, #tpu.memory_space<vmem>>, %arg12: memref<1x64xf32, #tpu.memory_space<vmem>>, %arg13: memref<10x64xf32, #tpu.memory_space<vmem>>, %arg14: memref<64x64xf32, #tpu.memory_space<vmem>>, %arg15: memref<64x10xf32, #tpu.memory_space<vmem>>, %arg16: memref<1x10xf32, #tpu.memory_space<vmem>>, %arg17: memref<64x3xf32, #tpu.memory_space<vmem>>, %arg18: memref<2x2xf32, #tpu.memory_space<vmem>>, %arg19: memref<2x1xf32, #tpu.memory_space<vmem>>) attributes {dimension_semantics = [], scalar_prefetch = 0 : i64, scratch_operands = 0 : i64, tpu.core_type = #tpu.core_type<tc>} {
    %c0 = arith.constant 0 : index
    %c0_0 = arith.constant 0 : index
    %0 = vector.load %arg0[%c0, %c0_0] : memref<2x3xf32, #tpu.memory_space<vmem>>, vector<2x3xf32>
    %c0_1 = arith.constant 0 : index
    %c0_2 = arith.constant 0 : index
    %1 = vector.load %arg1[%c0_1, %c0_2] : memref<1x3xf32, #tpu.memory_space<vmem>>, vector<1x3xf32>
    %cst = arith.constant 0.000000e+00 : f32
    %2 = vector.broadcast %cst : f32 to vector<2x2xf32>
    %3 = tpu.iota {dimensions = array<i32: 1>} : vector<2x2xi32>
    %c0_3 = arith.constant 0 : index
    %c0_4 = arith.constant 0 : index
    %4 = vector.load %arg4[%c0_3, %c0_4] : memref<3x32xf32, #tpu.memory_space<vmem>>, vector<3x32xf32>
    %c0_5 = arith.constant 0 : index
    %c0_6 = arith.constant 0 : index
    %5 = vector.load %arg5[%c0_5, %c0_6] : memref<1x32xf32, #tpu.memory_space<vmem>>, vector<1x32xf32>
    %c0_7 = arith.constant 0 : index
    %c0_8 = arith.constant 0 : index
    %6 = vector.load %arg6[%c0_7, %c0_8] : memref<10x32xf32, #tpu.memory_space<vmem>>, vector<10x32xf32>
    %c0_9 = arith.constant 0 : index
    %c0_10 = arith.constant 0 : index
    %7 = vector.load %arg7[%c0_9, %c0_10] : memref<32x32xf32, #tpu.memory_space<vmem>>, vector<32x32xf32>
    %c0_11 = arith.constant 0 : index
    %c0_12 = arith.constant 0 : index
    %8 = vector.load %arg8[%c0_11, %c0_12] : memref<32x10xf32, #tpu.memory_space<vmem>>, vector<32x10xf32>
    %c0_13 = arith.constant 0 : index
    %c0_14 = arith.constant 0 : index
    %9 = vector.load %arg9[%c0_13, %c0_14] : memref<1x10xf32, #tpu.memory_space<vmem>>, vector<1x10xf32>
    %c0_15 = arith.constant 0 : index
    %c0_16 = arith.constant 0 : index
    %10 = vector.load %arg10[%c0_15, %c0_16] : memref<32x3xf32, #tpu.memory_space<vmem>>, vector<32x3xf32>
    %cst_17 = arith.constant dense<0.000000e+00> : vector<2x32xf32>
    %11 = tpu.matmul %0, %4, %cst_17 {dimension_numbers = #tpu.dot_dimension_numbers<[1], [0], [0], [1], [0, 0, 1, 1], [], []>} : vector<2x3xf32>, vector<3x32xf32>, vector<2x32xf32> -> vector<2x32xf32>
    %12 = vector.broadcast %5 : vector<1x32xf32> to vector<2x32xf32>
    %13 = arith.addf %11, %12 : vector<2x32xf32>
    %cst_18 = arith.constant dense<0.000000e+00> : vector<2x32xf32>
    %14 = tpu.matmul %13, %7, %cst_18 {dimension_numbers = #tpu.dot_dimension_numbers<[1], [0], [0], [1], [0, 0, 1, 1], [], []>} : vector<2x32xf32>, vector<32x32xf32>, vector<2x32xf32> -> vector<2x32xf32>
    %15 = arith.mulf %14, %13 : vector<2x32xf32>
    %cst_19 = arith.constant dense<0.000000e+00> : vector<2xf32>
    %16 = vector.multi_reduction <add>, %15, %cst_19 [1] : vector<2x32xf32> to vector<2xf32>
    %17 = vector.shape_cast %16 : vector<2xf32> to vector<2x1xf32>
    %cst_20 = arith.constant dense<0.000000e+00> : vector<2x10xf32>
    %18 = tpu.matmul %13, %8, %cst_20 {dimension_numbers = #tpu.dot_dimension_numbers<[1], [0], [0], [1], [0, 0, 1, 1], [], []>} : vector<2x32xf32>, vector<32x10xf32>, vector<2x10xf32> -> vector<2x10xf32>
    %19 = vector.broadcast %17 : vector<2x1xf32> to vector<2x10xf32>
    %20 = vector.broadcast %9 : vector<1x10xf32> to vector<2x10xf32>
    %21 = arith.addf %19, %20 : vector<2x10xf32>
    %cst_21 = arith.constant 5.000000e-01 : f32
    %22 = vector.broadcast %cst_21 : f32 to vector<2x10xf32>
    %23 = arith.mulf %22, %21 : vector<2x10xf32>
    %24 = arith.subf %18, %23 : vector<2x10xf32>
    %cst_22 = arith.constant dense<0xFF800000> : vector<2xf32>
    %25 = vector.multi_reduction <maximumf>, %24, %cst_22 [1] : vector<2x10xf32> to vector<2xf32>
    %26 = vector.shape_cast %25 : vector<2xf32> to vector<2x1xf32>
    %27 = tpu.iota {dimensions = array<i32: 1>} : vector<2x10xi32>
    %28 = arith.sitofp %27 : vector<2x10xi32> to vector<2x10xf32>
    %29 = vector.broadcast %26 : vector<2x1xf32> to vector<2x10xf32>
    %30 = arith.cmpf oge, %24, %29 : vector<2x10xf32>
    %cst_23 = arith.constant 1.000000e+01 : f32
    %31 = vector.broadcast %cst_23 : f32 to vector<2x10xf32>
    %32 = arith.select %30, %28, %31 : vector<2x10xi1>, vector<2x10xf32>
    %cst_24 = arith.constant dense<0x7F800000> : vector<2xf32>
    %33 = vector.multi_reduction <minimumf>, %32, %cst_24 [1] : vector<2x10xf32> to vector<2xf32>
    %34 = vector.shape_cast %33 : vector<2xf32> to vector<2x1xf32>
    %35 = vector.broadcast %34 : vector<2x1xf32> to vector<2x10xf32>
    %36 = arith.cmpf oeq, %28, %35 : vector<2x10xf32>
    %37 = arith.extui %36 : vector<2x10xi1> to vector<2x10xi32>
    %38 = arith.sitofp %37 : vector<2x10xi32> to vector<2x10xf32>
    %cst_25 = arith.constant dense<0.000000e+00> : vector<2x32xf32>
    %39 = tpu.matmul %38, %6, %cst_25 {dimension_numbers = #tpu.dot_dimension_numbers<[1], [0], [0], [1], [0, 0, 1, 1], [], []>} : vector<2x10xf32>, vector<10x32xf32>, vector<2x32xf32> -> vector<2x32xf32>
    %40 = arith.subf %13, %39 : vector<2x32xf32>
    %cst_26 = arith.constant dense<0.000000e+00> : vector<2x3xf32>
    %41 = tpu.matmul %40, %10, %cst_26 {dimension_numbers = #tpu.dot_dimension_numbers<[1], [0], [0], [1], [0, 0, 1, 1], [], []>} : vector<2x32xf32>, vector<32x3xf32>, vector<2x3xf32> -> vector<2x3xf32>
    %cst_27 = arith.constant 0.000000e+00 : f32
    %42 = vector.broadcast %cst_27 : f32 to vector<2x3xf32>
    %43 = arith.cmpf oge, %41, %42 : vector<2x3xf32>
    %cst_28 = arith.constant 1.000000e+00 : f32
    %cst_29 = arith.constant -1.000000e+00 : f32
    %44 = vector.broadcast %cst_28 : f32 to vector<2x3xf32>
    %45 = vector.broadcast %cst_29 : f32 to vector<2x3xf32>
    %46 = arith.select %43, %44, %45 : vector<2x3xi1>, vector<2x3xf32>
    %47 = vector.broadcast %1 : vector<1x3xf32> to vector<2x3xf32>
    %48 = arith.mulf %46, %47 : vector<2x3xf32>
    %cst_30 = arith.constant dense<0.000000e+00> : vector<2x32xf32>
    %49 = tpu.matmul %48, %4, %cst_30 {dimension_numbers = #tpu.dot_dimension_numbers<[1], [0], [0], [1], [0, 0, 1, 1], [], []>} : vector<2x3xf32>, vector<3x32xf32>, vector<2x32xf32> -> vector<2x32xf32>
    %cst_31 = arith.constant 1.000000e-03 : f32
    %50 = vector.broadcast %cst_31 : f32 to vector<2x32xf32>
    %51 = arith.mulf %50, %49 : vector<2x32xf32>
    %52 = arith.subf %13, %51 : vector<2x32xf32>
    %cst_32 = arith.constant dense<0.000000e+00> : vector<2x32xf32>
    %53 = tpu.matmul %52, %7, %cst_32 {dimension_numbers = #tpu.dot_dimension_numbers<[1], [0], [0], [1], [0, 0, 1, 1], [], []>} : vector<2x32xf32>, vector<32x32xf32>, vector<2x32xf32> -> vector<2x32xf32>
    %54 = arith.mulf %53, %52 : vector<2x32xf32>
    %cst_33 = arith.constant dense<0.000000e+00> : vector<2xf32>
    %55 = vector.multi_reduction <add>, %54, %cst_33 [1] : vector<2x32xf32> to vector<2xf32>
    %56 = vector.shape_cast %55 : vector<2xf32> to vector<2x1xf32>
    %cst_34 = arith.constant dense<0.000000e+00> : vector<2x10xf32>
    %57 = tpu.matmul %52, %8, %cst_34 {dimension_numbers = #tpu.dot_dimension_numbers<[1], [0], [0], [1], [0, 0, 1, 1], [], []>} : vector<2x32xf32>, vector<32x10xf32>, vector<2x10xf32> -> vector<2x10xf32>
    %58 = vector.broadcast %56 : vector<2x1xf32> to vector<2x10xf32>
    %59 = vector.broadcast %9 : vector<1x10xf32> to vector<2x10xf32>
    %60 = arith.addf %58, %59 : vector<2x10xf32>
    %cst_35 = arith.constant 5.000000e-01 : f32
    %61 = vector.broadcast %cst_35 : f32 to vector<2x10xf32>
    %62 = arith.mulf %61, %60 : vector<2x10xf32>
    %63 = arith.subf %57, %62 : vector<2x10xf32>
    %cst_36 = arith.constant dense<0xFF800000> : vector<2xf32>
    %64 = vector.multi_reduction <maximumf>, %63, %cst_36 [1] : vector<2x10xf32> to vector<2xf32>
    %65 = vector.shape_cast %64 : vector<2xf32> to vector<2x1xf32>
    %c0_i32 = arith.constant 0 : i32
    %66 = vector.broadcast %c0_i32 : i32 to vector<2x2xi32>
    %67 = arith.cmpi eq, %3, %66 : vector<2x2xi32>
    %cst_37 = arith.constant 0.000000e+00 : f32
    %68 = vector.shape_cast %65 : vector<2x1xf32> to vector<2x1xf32>
    %69 = vector.broadcast %68 : vector<2x1xf32> to vector<2x2xf32>
    %70 = vector.broadcast %cst_37 : f32 to vector<2x2xf32>
    %71 = arith.select %67, %69, %70 : vector<2x2xi1>, vector<2x2xf32>
    %72 = arith.addf %2, %71 : vector<2x2xf32>
    %c0_38 = arith.constant 0 : index
    %c0_39 = arith.constant 0 : index
    %73 = vector.load %arg11[%c0_38, %c0_39] : memref<3x64xf32, #tpu.memory_space<vmem>>, vector<3x64xf32>
    %c0_40 = arith.constant 0 : index
    %c0_41 = arith.constant 0 : index
    %74 = vector.load %arg12[%c0_40, %c0_41] : memref<1x64xf32, #tpu.memory_space<vmem>>, vector<1x64xf32>
    %c0_42 = arith.constant 0 : index
    %c0_43 = arith.constant 0 : index
    %75 = vector.load %arg13[%c0_42, %c0_43] : memref<10x64xf32, #tpu.memory_space<vmem>>, vector<10x64xf32>
    %c0_44 = arith.constant 0 : index
    %c0_45 = arith.constant 0 : index
    %76 = vector.load %arg14[%c0_44, %c0_45] : memref<64x64xf32, #tpu.memory_space<vmem>>, vector<64x64xf32>
    %c0_46 = arith.constant 0 : index
    %c0_47 = arith.constant 0 : index
    %77 = vector.load %arg15[%c0_46, %c0_47] : memref<64x10xf32, #tpu.memory_space<vmem>>, vector<64x10xf32>
    %c0_48 = arith.constant 0 : index
    %c0_49 = arith.constant 0 : index
    %78 = vector.load %arg16[%c0_48, %c0_49] : memref<1x10xf32, #tpu.memory_space<vmem>>, vector<1x10xf32>
    %c0_50 = arith.constant 0 : index
    %c0_51 = arith.constant 0 : index
    %79 = vector.load %arg17[%c0_50, %c0_51] : memref<64x3xf32, #tpu.memory_space<vmem>>, vector<64x3xf32>
    %cst_52 = arith.constant dense<0.000000e+00> : vector<2x64xf32>
    %80 = tpu.matmul %0, %73, %cst_52 {dimension_numbers = #tpu.dot_dimension_numbers<[1], [0], [0], [1], [0, 0, 1, 1], [], []>} : vector<2x3xf32>, vector<3x64xf32>, vector<2x64xf32> -> vector<2x64xf32>
    %81 = vector.broadcast %74 : vector<1x64xf32> to vector<2x64xf32>
    %82 = arith.addf %80, %81 : vector<2x64xf32>
    %cst_53 = arith.constant dense<0.000000e+00> : vector<2x64xf32>
    %83 = tpu.matmul %82, %76, %cst_53 {dimension_numbers = #tpu.dot_dimension_numbers<[1], [0], [0], [1], [0, 0, 1, 1], [], []>} : vector<2x64xf32>, vector<64x64xf32>, vector<2x64xf32> -> vector<2x64xf32>
    %84 = arith.mulf %83, %82 : vector<2x64xf32>
    %cst_54 = arith.constant dense<0.000000e+00> : vector<2xf32>
    %85 = vector.multi_reduction <add>, %84, %cst_54 [1] : vector<2x64xf32> to vector<2xf32>
    %86 = vector.shape_cast %85 : vector<2xf32> to vector<2x1xf32>
    %cst_55 = arith.constant dense<0.000000e+00> : vector<2x10xf32>
    %87 = tpu.matmul %82, %77, %cst_55 {dimension_numbers = #tpu.dot_dimension_numbers<[1], [0], [0], [1], [0, 0, 1, 1], [], []>} : vector<2x64xf32>, vector<64x10xf32>, vector<2x10xf32> -> vector<2x10xf32>
    %88 = vector.broadcast %86 : vector<2x1xf32> to vector<2x10xf32>
    %89 = vector.broadcast %78 : vector<1x10xf32> to vector<2x10xf32>
    %90 = arith.addf %88, %89 : vector<2x10xf32>
    %cst_56 = arith.constant 5.000000e-01 : f32
    %91 = vector.broadcast %cst_56 : f32 to vector<2x10xf32>
    %92 = arith.mulf %91, %90 : vector<2x10xf32>
    %93 = arith.subf %87, %92 : vector<2x10xf32>
    %cst_57 = arith.constant dense<0xFF800000> : vector<2xf32>
    %94 = vector.multi_reduction <maximumf>, %93, %cst_57 [1] : vector<2x10xf32> to vector<2xf32>
    %95 = vector.shape_cast %94 : vector<2xf32> to vector<2x1xf32>
    %96 = tpu.iota {dimensions = array<i32: 1>} : vector<2x10xi32>
    %97 = arith.sitofp %96 : vector<2x10xi32> to vector<2x10xf32>
    %98 = vector.broadcast %95 : vector<2x1xf32> to vector<2x10xf32>
    %99 = arith.cmpf oge, %93, %98 : vector<2x10xf32>
    %cst_58 = arith.constant 1.000000e+01 : f32
    %100 = vector.broadcast %cst_58 : f32 to vector<2x10xf32>
    %101 = arith.select %99, %97, %100 : vector<2x10xi1>, vector<2x10xf32>
    %cst_59 = arith.constant dense<0x7F800000> : vector<2xf32>
    %102 = vector.multi_reduction <minimumf>, %101, %cst_59 [1] : vector<2x10xf32> to vector<2xf32>
    %103 = vector.shape_cast %102 : vector<2xf32> to vector<2x1xf32>
    %104 = vector.broadcast %103 : vector<2x1xf32> to vector<2x10xf32>
    %105 = arith.cmpf oeq, %97, %104 : vector<2x10xf32>
    %106 = arith.extui %105 : vector<2x10xi1> to vector<2x10xi32>
    %107 = arith.sitofp %106 : vector<2x10xi32> to vector<2x10xf32>
    %cst_60 = arith.constant dense<0.000000e+00> : vector<2x64xf32>
    %108 = tpu.matmul %107, %75, %cst_60 {dimension_numbers = #tpu.dot_dimension_numbers<[1], [0], [0], [1], [0, 0, 1, 1], [], []>} : vector<2x10xf32>, vector<10x64xf32>, vector<2x64xf32> -> vector<2x64xf32>
    %109 = arith.subf %82, %108 : vector<2x64xf32>
    %cst_61 = arith.constant dense<0.000000e+00> : vector<2x3xf32>
    %110 = tpu.matmul %109, %79, %cst_61 {dimension_numbers = #tpu.dot_dimension_numbers<[1], [0], [0], [1], [0, 0, 1, 1], [], []>} : vector<2x64xf32>, vector<64x3xf32>, vector<2x3xf32> -> vector<2x3xf32>
    %cst_62 = arith.constant 0.000000e+00 : f32
    %111 = vector.broadcast %cst_62 : f32 to vector<2x3xf32>
    %112 = arith.cmpf oge, %110, %111 : vector<2x3xf32>
    %cst_63 = arith.constant 1.000000e+00 : f32
    %cst_64 = arith.constant -1.000000e+00 : f32
    %113 = vector.broadcast %cst_63 : f32 to vector<2x3xf32>
    %114 = vector.broadcast %cst_64 : f32 to vector<2x3xf32>
    %115 = arith.select %112, %113, %114 : vector<2x3xi1>, vector<2x3xf32>
    %116 = vector.broadcast %1 : vector<1x3xf32> to vector<2x3xf32>
    %117 = arith.mulf %115, %116 : vector<2x3xf32>
    %cst_65 = arith.constant dense<0.000000e+00> : vector<2x64xf32>
    %118 = tpu.matmul %117, %73, %cst_65 {dimension_numbers = #tpu.dot_dimension_numbers<[1], [0], [0], [1], [0, 0, 1, 1], [], []>} : vector<2x3xf32>, vector<3x64xf32>, vector<2x64xf32> -> vector<2x64xf32>
    %cst_66 = arith.constant 1.000000e-03 : f32
    %119 = vector.broadcast %cst_66 : f32 to vector<2x64xf32>
    %120 = arith.mulf %119, %118 : vector<2x64xf32>
    %121 = arith.subf %82, %120 : vector<2x64xf32>
    %cst_67 = arith.constant dense<0.000000e+00> : vector<2x64xf32>
    %122 = tpu.matmul %121, %76, %cst_67 {dimension_numbers = #tpu.dot_dimension_numbers<[1], [0], [0], [1], [0, 0, 1, 1], [], []>} : vector<2x64xf32>, vector<64x64xf32>, vector<2x64xf32> -> vector<2x64xf32>
    %123 = arith.mulf %122, %121 : vector<2x64xf32>
    %cst_68 = arith.constant dense<0.000000e+00> : vector<2xf32>
    %124 = vector.multi_reduction <add>, %123, %cst_68 [1] : vector<2x64xf32> to vector<2xf32>
    %125 = vector.shape_cast %124 : vector<2xf32> to vector<2x1xf32>
    %cst_69 = arith.constant dense<0.000000e+00> : vector<2x10xf32>
    %126 = tpu.matmul %121, %77, %cst_69 {dimension_numbers = #tpu.dot_dimension_numbers<[1], [0], [0], [1], [0, 0, 1, 1], [], []>} : vector<2x64xf32>, vector<64x10xf32>, vector<2x10xf32> -> vector<2x10xf32>
    %127 = vector.broadcast %125 : vector<2x1xf32> to vector<2x10xf32>
    %128 = vector.broadcast %78 : vector<1x10xf32> to vector<2x10xf32>
    %129 = arith.addf %127, %128 : vector<2x10xf32>
    %cst_70 = arith.constant 5.000000e-01 : f32
    %130 = vector.broadcast %cst_70 : f32 to vector<2x10xf32>
    %131 = arith.mulf %130, %129 : vector<2x10xf32>
    %132 = arith.subf %126, %131 : vector<2x10xf32>
    %cst_71 = arith.constant dense<0xFF800000> : vector<2xf32>
    %133 = vector.multi_reduction <maximumf>, %132, %cst_71 [1] : vector<2x10xf32> to vector<2xf32>
    %134 = vector.shape_cast %133 : vector<2xf32> to vector<2x1xf32>
    %c1_i32 = arith.constant 1 : i32
    %135 = vector.broadcast %c1_i32 : i32 to vector<2x2xi32>
    %136 = arith.cmpi eq, %3, %135 : vector<2x2xi32>
    %cst_72 = arith.constant 0.000000e+00 : f32
    %137 = vector.shape_cast %134 : vector<2x1xf32> to vector<2x1xf32>
    %138 = vector.broadcast %137 : vector<2x1xf32> to vector<2x2xf32>
    %139 = vector.broadcast %cst_72 : f32 to vector<2x2xf32>
    %140 = arith.select %136, %138, %139 : vector<2x2xi1>, vector<2x2xf32>
    %141 = arith.addf %72, %140 : vector<2x2xf32>
    %c0_73 = arith.constant 0 : index
    %c0_74 = arith.constant 0 : index
    %142 = vector.load %arg18[%c0_73, %c0_74] : memref<2x2xf32, #tpu.memory_space<vmem>>, vector<2x2xf32>
    tpu.vector_store %arg18[%c0_73, %c0_74], %141 {strides = array<i32>} : memref<2x2xf32, #tpu.memory_space<vmem>>, vector<2x2xf32>,
    %c0_75 = arith.constant 0 : index
    %c0_76 = arith.constant 0 : index
    %143 = vector.load %arg2[%c0_75, %c0_76] : memref<2x1xf32, #tpu.memory_space<vmem>>, vector<2x1xf32>
    %cst_77 = arith.constant dense<0.000000e+00> : vector<2x1xf32>
    %144 = tpu.matmul %141, %143, %cst_77 {dimension_numbers = #tpu.dot_dimension_numbers<[1], [0], [0], [1], [0, 0, 1, 1], [], []>} : vector<2x2xf32>, vector<2x1xf32>, vector<2x1xf32> -> vector<2x1xf32>
    %c0_78 = arith.constant 0 : index
    %c0_79 = arith.constant 0 : index
    %145 = vector.load %arg3[%c0_78, %c0_79] : memref<1x1xf32, #tpu.memory_space<vmem>>, vector<1x1xf32>
    %146 = vector.broadcast %145 : vector<1x1xf32> to vector<2x1xf32>
    %147 = arith.addf %144, %146 : vector<2x1xf32>
    %148 = arith.negf %147 : vector<2x1xf32>
    %149 = math.exp %148 : vector<2x1xf32>
    %cst_80 = arith.constant 1.000000e+00 : f32
    %150 = vector.broadcast %cst_80 : f32 to vector<2x1xf32>
    %151 = arith.addf %150, %149 : vector<2x1xf32>
    %152 = arith.divf %150, %151 : vector<2x1xf32>
    %c0_81 = arith.constant 0 : index
    %c0_82 = arith.constant 0 : index
    %153 = vector.load %arg19[%c0_81, %c0_82] : memref<2x1xf32, #tpu.memory_space<vmem>>, vector<2x1xf32>
    tpu.vector_store %arg19[%c0_81, %c0_82], %152 {strides = array<i32>} : memref<2x1xf32, #tpu.memory_space<vmem>>, vector<2x1xf32>,
    return
  }
}

module attributes {stable_mosaic.version = 11 : i64} {
  func.func @_spatial_mean_kernel(%arg0: i32, %arg1: i32, %arg2: memref<8x1024xf32, #tpu.memory_space<vmem>>, %arg3: memref<8x1xf32, #tpu.memory_space<vmem>>) attributes {dimension_semantics = [#tpu.dimension_semantics<parallel>, #tpu.dimension_semantics<arbitrary>], iteration_bounds = array<i64: 1, 1>, scalar_prefetch = 0 : i64, scratch_operands = 0 : i64, tpu.core_type = #tpu.core_type<tc>, window_params = [{transform_indices = @transform_0, window_bounds = array<i64: 8, 1024>}, {transform_indices = @transform_1, window_bounds = array<i64: 8, 1>}]} {
    %c0_i32 = arith.constant 0 : i32
    %0 = arith.cmpi eq, %arg1, %c0_i32 : i32
    %1 = arith.extui %0 : i1 to i32
    %c0_i32_0 = arith.constant 0 : i32
    %2 = arith.cmpi ne, %1, %c0_i32_0 : i32
    scf.if %2 {
      %cst_8 = arith.constant 0.000000e+00 : f32
      %12 = vector.broadcast %cst_8 : f32 to vector<8x1xf32>
      %c0_9 = arith.constant 0 : index
      %c0_10 = arith.constant 0 : index
      %13 = vector.load %arg3[%c0_9, %c0_10] : memref<8x1xf32, #tpu.memory_space<vmem>>, vector<8x1xf32>
      tpu.vector_store %arg3[%c0_9, %c0_10], %12 {strides = array<i32>} : memref<8x1xf32, #tpu.memory_space<vmem>>, vector<8x1xf32>,
    } else {
    }
    %c0 = arith.constant 0 : index
    %c0_1 = arith.constant 0 : index
    %3 = vector.load %arg3[%c0, %c0_1] : memref<8x1xf32, #tpu.memory_space<vmem>>, vector<8x1xf32>
    %c0_2 = arith.constant 0 : index
    %c0_3 = arith.constant 0 : index
    %4 = vector.load %arg2[%c0_2, %c0_3] : memref<8x1024xf32, #tpu.memory_space<vmem>>, vector<8x1024xf32>
    %cst = arith.constant dense<0.000000e+00> : vector<8xf32>
    %5 = vector.multi_reduction <add>, %4, %cst [1] : vector<8x1024xf32> to vector<8xf32>
    %6 = vector.shape_cast %5 : vector<8xf32> to vector<8x1xf32>
    %7 = arith.addf %3, %6 : vector<8x1xf32>
    %c0_4 = arith.constant 0 : index
    %c0_5 = arith.constant 0 : index
    %8 = vector.load %arg3[%c0_4, %c0_5] : memref<8x1xf32, #tpu.memory_space<vmem>>, vector<8x1xf32>
    tpu.vector_store %arg3[%c0_4, %c0_5], %7 {strides = array<i32>} : memref<8x1xf32, #tpu.memory_space<vmem>>, vector<8x1xf32>,
    %c0_i32_6 = arith.constant 0 : i32
    %9 = arith.cmpi eq, %arg1, %c0_i32_6 : i32
    %10 = arith.extui %9 : i1 to i32
    %c0_i32_7 = arith.constant 0 : i32
    %11 = arith.cmpi ne, %10, %c0_i32_7 : i32
    scf.if %11 {
      %c0_8 = arith.constant 0 : index
      %c0_9 = arith.constant 0 : index
      %12 = vector.load %arg3[%c0_8, %c0_9] : memref<8x1xf32, #tpu.memory_space<vmem>>, vector<8x1xf32>
      %cst_10 = arith.constant 9.765625E-4 : f32
      %13 = vector.broadcast %cst_10 : f32 to vector<8x1xf32>
      %14 = arith.mulf %12, %13 : vector<8x1xf32>
      %c0_11 = arith.constant 0 : index
      %c0_12 = arith.constant 0 : index
      %15 = vector.load %arg3[%c0_11, %c0_12] : memref<8x1xf32, #tpu.memory_space<vmem>>, vector<8x1xf32>
      tpu.vector_store %arg3[%c0_11, %c0_12], %14 {strides = array<i32>} : memref<8x1xf32, #tpu.memory_space<vmem>>, vector<8x1xf32>,
    } else {
    }
    return
  }
  func.func @transform_0(%arg0: i32, %arg1: i32) -> (i32, i32) {
    %c0_i32 = arith.constant 0 : i32
    return %arg0, %arg1 : i32, i32
  }
  func.func @transform_1(%arg0: i32, %arg1: i32) -> (i32, i32) {
    %c0_i32 = arith.constant 0 : i32
    %c0_i32_0 = arith.constant 0 : i32
    return %arg0, %c0_i32 : i32, i32
  }
}

</mosaic_0001>

<bundles_post_ra>
// kernel: squeeze.2
= control target key start
LH: loop header
LB: loop body
LE: loop exit
PB: predicated region body
PF: predicated region fallthrough
CT: control target
= control target key end

     0   :  { %vm7_vm0 = vcmask 23552   ;;  %s39_s0 = inlined_call_operand.vmem [shape: f32[6], index: 0, kind: input, shape index: {}]   ;;  %s40_s1 = inlined_call_operand.vmem [shape: f32[2,3], index: 1, kind: output, shape index: {}]  }
   0x1   :  { %v4_v0 = vld [vmem:[%s39_s0] sm:$0x1]  ;;  %s22_s0 = smov 125  }
   0x2   :  { %5 = vst [vmem:[#allocation1] sm:$0x1] %v4_v0 }
   0x9   :  { %v9_v1 = vld [vmem:[#allocation1] sm:$0x1]  }
   0xa   :  { %v6_v2 = vld [vmem:[#allocation1] sm:$0x1]   ;;  %10 = vrot.lane.b32.xlu0 %v9_v1, %s22_s0 }
   0xb   :  { %8 = vst.msk [vmem:[#allocation0] sm:$0x1] %vm7_vm0, %v6_v2  }
  0x7c   :  { %v11_v3 = vpop.permute.xlu0 %10  }
  0x7d   :  { %14 = vst.msk [vmem:[#allocation0 + $0x1] sm:$0x1] %vm7_vm0, %v11_v3  }
  0x84   :  { %v17_v4 = vld [vmem:[#allocation0] sm:$0x3] }
  0x85   :  { %20 = vst [vmem:[%s40_s1] sm:$0x3] %v17_v4 }

// kernel: forward.2
= control target key start
LH: loop header
LB: loop body
LE: loop exit
PB: predicated region body
PF: predicated region fallthrough
CT: control target
= control target key end

     0   :  { %vm12_vm0 = vcmask 7168   ;;  %v46_v3 = vmov 0.0   ;;  %s99_s0 = inlined_call_operand.vmem [shape: f32[8,1024], index: 0, kind: input, shape index: {}]   ;;  %s100_s1 = inlined_call_operand.vmem [shape: f32[8,1], index: 1, kind: output, shape index: {}]  }
   0x1   :  { %v15_v0 = vld [vmem:[%s99_s0] sm:$0xff]  ;;  %v16_v1 = vld [vmem:[%s99_s0 + $0x8] sm:$0xff]  ;;  %v17_v2 = vld [vmem:[%s99_s0 + $0x10] sm:$0xff]  ;;  %13 = vst.msk [vmem:[%s100_s1] sm:$0xff] %vm12_vm0, %v46_v3 }
   0x2   :  { %v23_v4 = vadd.f32 %v16_v1, %v15_v0  ;;  %v18_v5 = vld [vmem:[%s99_s0 + $0x18] sm:$0xff]  ;;  %v19_v7 = vld [vmem:[%s99_s0 + $0x20] sm:$0xff]  ;;  %v20_v9 = vld [vmem:[%s99_s0 + $0x28] sm:$0xff] }
   0x3   :  { %v21_v11 = vld [vmem:[%s99_s0 + $0x30] sm:$0xff]  ;;  %v22_v13 = vld [vmem:[%s99_s0 + $0x38] sm:$0xff] }
   0x4   :  { %v24_v6 = vadd.f32 %v23_v4, %v17_v2 }
   0x6   :  { %v25_v8 = vadd.f32 %v24_v6, %v18_v5 }
   0x8   :  { %v26_v10 = vadd.f32 %v25_v8, %v19_v7  ;;  %v14_v16 = vld [vmem:[%s100_s1] sm:$0xff] }
   0xa   :  { %v27_v12 = vadd.f32 %v26_v10, %v20_v9 }
   0xc   :  { %v28_v14 = vadd.f32 %v27_v12, %v21_v11 }
   0xe   :  { %v29_v15 = vadd.f32 %v28_v14, %v22_v13 }
  0x10   :  { %30 = vadd.xlane.f32.xlu0 %v29_v15 }
  0x83   :  { %v31_v17 = vpop.xlane.xlu0 %30 }
  0x84   :  { %v32_v18 = vadd.f32 %v31_v17, %v14_v16 }
  0x86   :  { %34 = vst.msk [vmem:[%s100_s1] sm:$0xff] %vm12_vm0, %v32_v18 }
  0x8d   :  { %v38_v19 = vld [vmem:[%s100_s1] sm:$0xff] }
  0x8e   :  { %v39_v20 = vmul.f32 0.0009765625, %v38_v19 }
  0x90   :  { %40 = vst.msk [vmem:[%s100_s1] sm:$0xff] %vm12_vm0, %v39_v20 }

// kernel: forward.3
= control target key start
LH: loop header
LB: loop body
LE: loop exit
PB: predicated region body
PF: predicated region fallthrough
CT: control target
= control target key end

     0   :  { %s1060_s0 = inlined_call_operand.vmem [shape: f32[2,3], index: 0, kind: input, shape index: {}]   ;;  %s1061_s1 = inlined_call_operand.vmem [shape: f32[1,3], index: 1, kind: input, shape index: {}]   ;;  %s1062_s2 = inlined_call_operand.vmem [shape: f32[2,1], index: 2, kind: input, shape index: {}]   ;;  %s1063_s3 = inlined_call_operand.<no memory space> [shape: f32[1,1], index: 3, kind: input, shape index: {}]   ;;  %s1064_s4 = inlined_call_operand.vmem [shape: f32[3,32], index: 4, kind: input, shape index: {}]   ;;  %s1065_s5 = inlined_call_operand.vmem [shape: f32[1,32], index: 5, kind: input, shape index: {}]   ;;  %s1066_s6 = inlined_call_operand.vmem [shape: f32[10,32], index: 6, kind: input, shape index: {}]   ;;  %s1067_s7 = inlined_call_operand.vmem [shape: f32[32,32], index: 7, kind: input, shape index: {}]   ;;  %s1068_s8 = inlined_call_operand.vmem [shape: f32[32,10], index: 8, kind: input, shape index: {}]   ;;  %s1069_s9 = inlined_call_operand.vmem [shape: f32[1,10], index: 9, kind: input, shape index: {}]   ;;  %s1070_s10 = inlined_call_operand.vmem [shape: f32[32,3], index: 10, kind: input, shape index: {}]   ;;  %s1071_s11 = inlined_call_operand.vmem [shape: f32[3,64], index: 11, kind: input, shape index: {}]   ;;  %s1072_s12 = inlined_call_operand.vmem [shape: f32[1,64], index: 12, kind: input, shape index: {}]   ;;  %s1073_s13 = inlined_call_operand.vmem [shape: f32[10,64], index: 13, kind: input, shape index: {}]   ;;  %s1074_s14 = inlined_call_operand.vmem [shape: f32[64,64], index: 14, kind: input, shape index: {}]   ;;  %s1075_s15 = inlined_call_operand.vmem [shape: f32[64,10], index: 15, kind: input, shape index: {}]   ;;  %s1076_s16 = inlined_call_operand.vmem [shape: f32[1,10], index: 16, kind: input, shape index: {}]   ;;  %s1077_s17 = inlined_call_operand.vmem [shape: f32[64,3], index: 17, kind: input, shape index: {}]   ;;  %s1078_s18 = inlined_call_operand.hbm [shape: f32[2,2], index: 18, kind: output, shape index: {0}]   ;;  %s1079_s19 = inlined_call_operand.vmem [shape: f32[2,1], index: 19, kind: output, shape index: {1}]  }
   0x1   :  { %1080 = sst [smem:[#allocation6_spill]] %s1060_s0 }
   0x2   :  { %1081 = sst [smem:[#allocation7_spill]] %s1061_s1 }
   0x3   :  { %1082 = sst [smem:[#allocation8_spill]] %s1062_s2 }
   0x4   :  { %1083 = sst [smem:[#allocation9_spill]] %s1063_s3 }
   0x5   :  { %s1084_s20 = sld [smem:[#allocation9_spill]] }
   0xb   :  { %v25_v0 = vstv %s1084_s20 }
   0xc   :  { %26 = vst [vmem:[#allocation2] sm:$0x1] %v25_v0 }
   0xd   :  { %v68_v1 = vld [vmem:[%s1064_s4] sm:$0x7]  ;;  %vm92_vm0 = vcmask 1042432   ;;  %s1085_s23 = sld [smem:[#allocation6_spill]]  ;;  %vm88_vm1 = vcmask 23552   ;;  %v75_v3 = vld [vmem:[%s1067_s7 + $0x18] sm:$0xff] }
   0xe   :  { %653 = vmatpush.msk.msra.mxu0 %vm92_vm0, %v68_v1  ;;  %v79_v4 = vld [vmem:[%s1068_s8 + $0x18] sm:$0xff]  ;;  %661 = vmatpush.msk.msra.mxu1 %vm92_vm0, %v68_v1  ;;  %v74_v5 = vld [vmem:[%s1067_s7 + $0x10] sm:$0xff]  ;;  %v73_v7 = vld [vmem:[%s1067_s7 + $0x8] sm:$0xff] }
   0xf   :  { %157 = vmatpush.msra.mxu2 %v79_v4  ;;  %v78_v6 = vld [vmem:[%s1068_s8 + $0x10] sm:$0xff] }
  0x10   :  { %132 = vmatpush.msrb.mxu0 %v75_v3  ;;  %282 = vmatpush.msrb.mxu1 %v75_v3 }
  0x11   :  { %158 = vmatpush.msra.mxu2 %v78_v6 }
  0x12   :  { %133 = vmatpush.msrb.mxu0 %v74_v5  ;;  %283 = vmatpush.msrb.mxu1 %v74_v5 }
  0x13   :  { %v831_v2 = vld [vmem:[%s1085_s23] sm:$0x3] }
  0x14   :  { %654 = vmatmul.msk.f32.vlgmr.msra.gmra.mxu0 %vm88_vm1, %v831_v2 }
  0x15   :  { %27 = vsyncpa [#allocation4], 0  ;;  %134 = vmatpush.msrb.mxu0 %v73_v7  ;;  %284 = vmatpush.msrb.mxu1 %v73_v7  ;;  %v77_v8 = vld [vmem:[%s1068_s8 + $0x8] sm:$0xff]  ;;  %v72_v9 = vld [vmem:[%s1067_s7] sm:$0xff]  ;;  %vm116_vm2 = vcmask 261120   ;;  %vm141_vm3 = vcmask 254976   ;;  %v66_v25 = vlaneseq }
  0x16   :  { %159 = vmatpush.msra.mxu2 %v77_v8  ;;  %v76_v10 = vld [vmem:[%s1068_s8] sm:$0xff]  ;;  %vm171_vm4 = vcmask 74752   ;;  %v71_v24 = vld [vmem:[%s1066_s6 + $0x8] sm:$0x3]  ;;  %vm188_vm5 = vcmask 1041408   ;;  %v84_v32 = vld [vmem:[%s1070_s10 + $0x18] sm:$0xff] }
  0x17   :  { %135 = vmatpush.msrb.mxu0 %v72_v9  ;;  %285 = vmatpush.msrb.mxu1 %v72_v9  ;;  %v683_v11 = vld [vmem:[%s1065_s5] ss:$0 sm:$0xff]  ;;  %v883_v26 = vand.u32 127, %v66_v25  ;;  %v83_v33 = vld [vmem:[%s1070_s10 + $0x10] sm:$0xff]  ;;  %v82_v34 = vld [vmem:[%s1070_s10 + $0x8] sm:$0xff]  ;;  %vm184_vm7 = vcmask 80896  }
  0x18   :  { %160 = vmatpush.msra.mxu2 %v76_v10  ;;  %v875_v17 = vld [vmem:[%s1069_s9] ss:$0 sm:$0xff]  ;;  %658 = vmatpush.msk.msra.mxu3 %vm188_vm5, %v71_v24  ;;  %v719_v36 = vmov 0.0   ;;  %v334_v40 = vld [vmem:[%s1074_s14 + $0x38] sm:$0xff]  ;;  %v333_v41 = vld [vmem:[%s1074_s14 + $0x30] sm:$0xff]  ;;  %s1086_s30 = sld [smem:[#allocation7_spill]] }
  0x19   :  { %v886_v27 = vcvt.s32.f32 %v883_v26  ;;  %v70_v31 = vld [vmem:[%s1066_s6] sm:$0xff]  ;;  %228 = vmatpush.msra.mxu0 %v84_v32  ;;  %v332_v44 = vld [vmem:[%s1074_s14 + $0x28] sm:$0xff]  ;;  %v330_v46 = vld [vmem:[%s1074_s14 + $0x18] sm:$0xff]  ;;  %v720_v52 = vmov -1.0   ;;  %vm378_vm10 = vcmask 523264   ;;  %vm403_vm11 = vcmask 517120  }
  0x1a   :  { %306 = vmatpush.msrb.mxu2 %v79_v4  ;;  %207 = vmatpush.msra.mxu3 %v70_v31  ;;  %v81_v38 = vld [vmem:[%s1070_s10] sm:$0xff]  ;;  %v329_v47 = vld [vmem:[%s1074_s14 + $0x10] sm:$0xff]  ;;  %v328_v48 = vld [vmem:[%s1074_s14 + $0x8] sm:$0xff]  ;;  %s1087_s7 = sld [smem:[#allocation8_spill]]  ;;  %vm320_vm15 = vcmp.eq.s32.totalorder %v883_v26, 0  ;;  %s721_s8 = smov [#allocation3]  }
  0x1b   :  { %229 = vmatpush.msra.mxu0 %v83_v33  ;;  %v911_v39 = vld [vmem:[%s1071_s11] sm:$0x7]  ;;  %v342_v55 = vld [vmem:[%s1075_s15 + $0x38] sm:$0xff]  ;;  %v341_v59 = vld [vmem:[%s1075_s15 + $0x30] sm:$0xff]  ;;  %s638_s5 = sshll.u32 %s721_s8, 4  ;;  %s639_s5 = int_to_ptr.vmem [resolvable:$true] %s638_s5 }
  0x1c   :  { %307 = vmatpush.msrb.mxu2 %v78_v6  ;;  %390 = vmatpush.msrb.mxu3 %v334_v40  ;;  %v331_v45 = vld [vmem:[%s1074_s14 + $0x20] sm:$0xff]  ;;  %v340_v60 = vld [vmem:[%s1075_s15 + $0x28] sm:$0xff]  ;;  %v338_v62 = vld [vmem:[%s1075_s15 + $0x18] sm:$0xff] }
  0x1d   :  { %230 = vmatpush.msra.mxu0 %v82_v34  ;;  %v327_v49 = vld [vmem:[%s1074_s14] sm:$0xff]  ;;  %v337_v63 = vld [vmem:[%s1075_s15 + $0x10] sm:$0xff]  ;;  %v336_v0 = vld [vmem:[%s1075_s15 + $0x8] sm:$0xff] }
  0x1e   :  { %308 = vmatpush.msrb.mxu2 %v77_v8  ;;  %391 = vmatpush.msrb.mxu3 %v333_v41  ;;  %v946_v50 = vld [vmem:[%s1086_s30] ss:$0 sm:$0xff]  ;;  %v351_v32 = vld [vmem:[%s1077_s17 + $0x38] sm:$0xff]  ;;  %v349_v33 = vld [vmem:[%s1077_s17 + $0x28] sm:$0xff] }
  0x1f   :  { %231 = vmatpush.msra.mxu0 %v81_v38  ;;  %v686_v56 = vld [vmem:[%s1072_s12] ss:$0 sm:$0xff] }
  0x20   :  { %309 = vmatpush.msrb.mxu2 %v76_v10  ;;  %392 = vmatpush.msrb.mxu3 %v332_v44  ;;  %v339_v61 = vld [vmem:[%s1075_s15 + $0x20] sm:$0xff] }
  0x21   :  { %v335_v1 = vld [vmem:[%s1075_s15] sm:$0xff]  ;;  %s640_s15 = sshll.u32 %s1078_s18, 4  ;;  %s641_s15 = int_to_ptr.hbm [resolvable:$true] %s640_s15 }
  0x22   :  { %393 = vmatpush.msrb.mxu3 %v331_v45  ;;  %v992_v8 = vld [vmem:[%s1076_s16] ss:$0 sm:$0xff] }
  0x23   :  { %v348_v34 = vld [vmem:[%s1077_s17 + $0x20] sm:$0xff] }
  0x24   :  { %394 = vmatpush.msrb.mxu3 %v330_v46 }
  0x26   :  { %395 = vmatpush.msrb.mxu3 %v329_v47 }
  0x28   :  { %396 = vmatpush.msrb.mxu3 %v328_v48 }
  0x2a   :  { %397 = vmatpush.msrb.mxu3 %v327_v49 }
  0x91   :  { %v113_v12 = vpop.f32.mrf.mxu0 }
  0x92   :  { %v864_v13 = vadd.f32 %v683_v11, %v113_v12 }
  0x94   :  { %655 = vmatmul.msk.f32.vlgmr.msrb.gmra.mxu0 %vm116_vm2, %v864_v13  ;;  %656 = vmatmul.msk.f32.vlgmr.msra.gmra.mxu2 %vm116_vm2, %v864_v13 }
  0x95   :  { %665 = vmatpush.msk.msrb.mxu0 %vm92_vm0, %v911_v39 }
 0x111   :  { %v137_v14 = vpop.f32.mrf.mxu0 }
 0x112   :  { %v140_v15 = vmul.f32 %v137_v14, %v864_v13 }
 0x114   :  { %v142_v16 = vsel %vm141_vm3, %v140_v15, 0.0 }
 0x115   :  { %143 = vadd.xlane.f32.xlu0 %v142_v16 }
 0x117   :  { %v162_v21 = vpop.f32.mrf.mxu2 }
 0x188   :  { %v144_v18 = vpop.xlane.xlu0 %143 }
 0x189   :  { %v168_v19 = vadd.f32 %v875_v17, %v144_v18 }
 0x18b   :  { %v169_v20 = vmul.f32 0.5, %v168_v19  ;;  %v326_v19 = vld [vmem:[%s1073_s13 + $0x8] sm:$0x3] }
 0x18c   :  { %670 = vmatpush.msk.msra.mxu2 %vm188_vm5, %v326_v19 }
 0x18d   :  { %v170_v22 = vsub.f32 %v162_v21, %v169_v20  ;;  %v325_v20 = vld [vmem:[%s1073_s13] sm:$0xff] }
 0x18e   :  { %465 = vmatpush.msra.mxu2 %v325_v20 }
 0x18f   :  { %v172_v23 = vsel %vm171_vm4, %v170_v22, -inf }
 0x190   :  { %173 = vmax.xlane.f32.xlu0 %v172_v23 }
 0x203   :  { %v174_v28 = vpop.xlane.xlu0 %173 }
 0x204   :  { %vm176_vm6 = vcmp.ge.f32.partialorder %v170_v22, %v174_v28 }
 0x205   :  { %v177_v29 = vsel %vm176_vm6, %v886_v27, 10.0  ;;  %vm631_vm6 = vcmask 1024  }
 0x206   :  { %v178_v30 = vsel %vm171_vm4, %v177_v29, inf }
 0x207   :  { %179 = vmin.xlane.f32.xlu1 %v178_v30 }
 0x27a   :  { %v180_v35 = vpop.xlane.xlu1 %179 }
 0x27b   :  { %vm181_vm8 = vcmp.eq.f32.partialorder %v886_v27, %v180_v35  ;;  %v347_v35 = vld [vmem:[%s1077_s17 + $0x18] sm:$0xff] }
 0x27c   :  { %v657_v37 = vsel %vm181_vm8, 1.0, %v719_v36 }
 0x27d   :  { %659 = vmatmul.msk.f32.vlgmr.msra.gmra.mxu3 %vm184_vm7, %v657_v37  ;;  %v346_v37 = vld [vmem:[%s1077_s17 + $0x10] sm:$0xff] }
 0x27e   :  { %533 = vmatpush.msra.mxu3 %v334_v40  ;;  %v345_v40 = vld [vmem:[%s1077_s17 + $0x8] sm:$0xff] }
 0x280   :  { %534 = vmatpush.msra.mxu3 %v333_v41  ;;  %v344_v41 = vld [vmem:[%s1077_s17] sm:$0xff] }
 0x282   :  { %535 = vmatpush.msra.mxu3 %v332_v44 }
 0x284   :  { %536 = vmatpush.msra.mxu3 %v331_v45 }
 0x286   :  { %537 = vmatpush.msra.mxu3 %v330_v46 }
 0x288   :  { %538 = vmatpush.msra.mxu3 %v329_v47 }
 0x28a   :  { %539 = vmatpush.msra.mxu3 %v328_v48 }
 0x28c   :  { %540 = vmatpush.msra.mxu3 %v327_v49 }
 0x300   :  { %v209_v42 = vpop.f32.mrf.mxu3 }
 0x301   :  { %v212_v43 = vsub.f32 %v864_v13, %v209_v42 }
 0x303   :  { %660 = vmatmul.msk.f32.vlgmr.msra.gmra.mxu0 %vm116_vm2, %v212_v43 }
 0x304   :  { %482 = vmatpush.msra.mxu0 %v351_v32 }
 0x30b   :  { %666 = vmatmul.msk.f32.vlgmr.msrb.gmra.mxu0 %vm88_vm1, %v831_v2 }
 0x380   :  { %v233_v51 = vpop.f32.mrf.mxu0 }
 0x381   :  { %vm236_vm9 = vcmp.ge.f32.partialorder %v233_v51, 0.0 }
 0x382   :  { %v237_v53 = vsel %vm236_vm9, 1.0, %v720_v52 }
 0x383   :  { %v241_v54 = vmul.f32 %v946_v50, %v237_v53 }
 0x385   :  { %662 = vmatmul.msk.f32.vlgmr.msra.gmra.mxu1 %vm88_vm1, %v241_v54 }
 0x386   :  { %415 = vmatpush.msra.mxu1 %v342_v55 }
 0x388   :  { %v375_v57 = vpop.f32.mrf.mxu0  ;;  %416 = vmatpush.msra.mxu1 %v341_v59 }
 0x389   :  { %v957_v58 = vadd.f32 %v686_v56, %v375_v57 }
 0x38a   :  { %417 = vmatpush.msra.mxu1 %v340_v60 }
 0x38b   :  { %667 = vmatmul.msk.f32.vlgmr.msrb.gmra.mxu3 %vm378_vm10, %v957_v58 }
 0x38c   :  { %418 = vmatpush.msra.mxu1 %v339_v61 }
 0x38e   :  { %419 = vmatpush.msra.mxu1 %v338_v62 }
 0x390   :  { %420 = vmatpush.msra.mxu1 %v337_v63 }
 0x392   :  { %421 = vmatpush.msra.mxu1 %v336_v0 }
 0x394   :  { %422 = vmatpush.msra.mxu1 %v335_v1 }
 0x402   :  { %v262_v2 = vpop.f32.mrf.mxu1 }
 0x403   :  { %v265_v3 = vmul.f32 0.001, %v262_v2 }
 0x405   :  { %v266_v4 = vsub.f32 %v864_v13, %v265_v3 }
 0x407   :  { %663 = vmatmul.msk.f32.vlgmr.msrb.gmra.mxu1 %vm116_vm2, %v266_v4  ;;  %664 = vmatmul.msk.f32.vlgmr.msrb.gmra.mxu2 %vm116_vm2, %v266_v4  ;;  %vm578_vm2 = vcmask 9216  }
 0x408   :  { %557 = vmatpush.msrb.mxu1 %v342_v55  ;;  %673 = vmatpush.msk.msrb.mxu2 %vm92_vm0, %v911_v39  ;;  %vm575_vm0 = vcmp.eq.s32.totalorder %v883_v26, 1 }
 0x40a   :  { %558 = vmatpush.msrb.mxu1 %v341_v59 }
 0x40c   :  { %559 = vmatpush.msrb.mxu1 %v340_v60 }
 0x40e   :  { %v399_v5 = vpop.f32.mrf.mxu3  ;;  %560 = vmatpush.msrb.mxu1 %v339_v61 }
 0x40f   :  { %v402_v6 = vmul.f32 %v399_v5, %v957_v58  ;;  %668 = vmatmul.msk.f32.vlgmr.msra.gmra.mxu1 %vm378_vm10, %v957_v58 }
 0x410   :  { %561 = vmatpush.msrb.mxu1 %v338_v62 }
 0x411   :  { %v404_v7 = vsel %vm403_vm11, %v402_v6, 0.0 }
 0x412   :  { %405 = vadd.xlane.f32.xlu1 %v404_v7  ;;  %562 = vmatpush.msrb.mxu1 %v337_v63  ;;  %v688_v63 = vld [vmem:[#allocation2] ss:$0 sm:$0xff] }
 0x414   :  { %563 = vmatpush.msrb.mxu1 %v336_v0 }
 0x416   :  { %564 = vmatpush.msrb.mxu1 %v335_v1 }
 0x484   :  { %v287_v9 = vpop.f32.mrf.mxu1 }
 0x485   :  { %v290_v10 = vmul.f32 %v287_v9, %v266_v4  ;;  %v406_v11 = vpop.xlane.xlu1 %405 }
 0x486   :  { %v430_v12 = vadd.f32 %v992_v8, %v406_v11 }
 0x487   :  { %v291_v13 = vsel %vm141_vm3, %v290_v10, 0.0 }
 0x488   :  { %292 = vadd.xlane.f32.xlu0 %v291_v13  ;;  %v431_v14 = vmul.f32 0.5, %v430_v12 }
 0x48a   :  { %v311_v29 = vpop.f32.mrf.mxu2 }
 0x48c   :  { %v424_v15 = vpop.f32.mrf.mxu1 }
 0x48d   :  { %v432_v16 = vsub.f32 %v424_v15, %v431_v14 }
 0x48f   :  { %v433_v18 = vsel %vm171_vm4, %v432_v16, -inf }
 0x490   :  { %434 = vmax.xlane.f32.xlu2 %v433_v18 }
 0x4fb   :  { %v293_v21 = vpop.xlane.xlu0 %292 }
 0x4fc   :  { %v314_v22 = vadd.f32 %v875_v17, %v293_v21  ;;  %v350_v17 = vld [vmem:[%s1077_s17 + $0x30] sm:$0xff] }
 0x4fd   :  { %483 = vmatpush.msra.mxu0 %v350_v17 }
 0x4fe   :  { %v315_v25 = vmul.f32 0.5, %v314_v22 }
 0x4ff   :  { %484 = vmatpush.msra.mxu0 %v349_v33 }
 0x500   :  { %v316_v30 = vsub.f32 %v311_v29, %v315_v25 }
 0x501   :  { %485 = vmatpush.msra.mxu0 %v348_v34 }
 0x502   :  { %v317_v31 = vsel %vm171_vm4, %v316_v30, -inf }
 0x503   :  { %v435_v23 = vpop.xlane.xlu2 %434  ;;  %486 = vmatpush.msra.mxu0 %v347_v35 }
 0x504   :  { %vm436_vm12 = vcmp.ge.f32.partialorder %v432_v16, %v435_v23 }
 0x505   :  { %v437_v24 = vsel %vm436_vm12, %v886_v27, 10.0  ;;  %487 = vmatpush.msra.mxu0 %v346_v37 }
 0x506   :  { %v438_v28 = vsel %vm171_vm4, %v437_v24, inf }
 0x507   :  { %439 = vmin.xlane.f32.xlu2 %v438_v28  ;;  %488 = vmatpush.msra.mxu0 %v345_v40 }
 0x509   :  { %489 = vmatpush.msra.mxu0 %v344_v41 }
 0x50f   :  { %318 = vmax.xlane.f32.xlu2 %v317_v31 }
 0x57a   :  { %v440_v38 = vpop.xlane.xlu2 %439 }
 0x57b   :  { %vm441_vm13 = vcmp.eq.f32.partialorder %v886_v27, %v440_v38 }
 0x57c   :  { %v669_v39 = vsel %vm441_vm13, 1.0, %v719_v36 }
 0x57d   :  { %671 = vmatmul.msk.f32.vlgmr.msra.gmra.mxu2 %vm184_vm7, %v669_v39 }
 0x600   :  { %v467_v42 = vpop.f32.mrf.mxu2 }
 0x601   :  { %v470_v43 = vsub.f32 %v957_v58, %v467_v42 }
 0x603   :  { %672 = vmatmul.msk.f32.vlgmr.msra.gmra.mxu0 %vm378_vm10, %v470_v43 }
 0x680   :  { %v491_v27 = vpop.f32.mrf.mxu0 }
 0x681   :  { %vm494_vm14 = vcmp.ge.f32.partialorder %v491_v27, 0.0 }
 0x682   :  { %v495_v36 = vsel %vm494_vm14, 1.0, %v720_v52  ;;  %v580_v52 = vld [vmem:[%s1087_s7] sm:$0x3] }
 0x683   :  { %v496_v44 = vmul.f32 %v946_v50, %v495_v36  ;;  %677 = vmatpush.msk.msra.mxu2 %vm188_vm5, %v580_v52 }
 0x685   :  { %674 = vmatmul.msk.f32.vlgmr.msrb.gmra.mxu2 %vm88_vm1, %v496_v44  ;;  %vm585_vm1 = vcmask 15360  }
 0x708   :  { %v517_v45 = vpop.f32.mrf.mxu2 }
 0x709   :  { %v520_v46 = vmul.f32 0.001, %v517_v45 }
 0x70b   :  { %v521_v47 = vsub.f32 %v957_v58, %v520_v46  ;;  %v319_v58 = vpop.xlane.xlu2 %318 }
 0x70c   :  { %v321_v60 = vsel %vm320_vm15, %v319_v58, 0.0 }
 0x70d   :  { %675 = vmatmul.msk.f32.vlgmr.msra.gmra.mxu3 %vm378_vm10, %v521_v47  ;;  %676 = vmatmul.msk.f32.vlgmr.msrb.gmra.mxu1 %vm378_vm10, %v521_v47 }
 0x78a   :  { %v566_v55 = vpop.f32.mrf.mxu1 }
 0x790   :  { %v542_v48 = vpop.f32.mrf.mxu3 }
 0x791   :  { %v545_v49 = vmul.f32 %v542_v48, %v521_v47 }
 0x793   :  { %v546_v51 = vsel %vm403_vm11, %v545_v49, 0.0 }
 0x794   :  { %547 = vadd.xlane.f32.xlu1 %v546_v51 }
 0x807   :  { %v548_v50 = vpop.xlane.xlu1 %547 }
 0x808   :  { %v569_v53 = vadd.f32 %v992_v8, %v548_v50 }
 0x80a   :  { %v570_v54 = vmul.f32 0.5, %v569_v53 }
 0x80c   :  { %v571_v56 = vsub.f32 %v566_v55, %v570_v54 }
 0x80e   :  { %v572_v57 = vsel %vm171_vm4, %v571_v56, -inf }
 0x80f   :  { %573 = vmax.xlane.f32.xlu0 %v572_v57 }
 0x882   :  { %v574_v59 = vpop.xlane.xlu0 %573 }
 0x883   :  { %v576_v61 = vsel %vm575_vm0, %v574_v59, 0.0 }
 0x884   :  { %v577_v62 = vadd.f32 %v576_v61, %v321_v60 }
 0x886   :  { %678 = vmatmul.msk.f32.vlgmr.msra.gmra.mxu2 %vm585_vm1, %v577_v62  ;;  %579 = vst.msk [vmem:[#allocation3] sm:$0x3] %vm578_vm2, %v577_v62 }
 0x887   :  { %643 = dma.vmem_to_hbm [thread:$0]  %s639_s5, 32, %s641_s15, [#allocation4]  }
 0x909   :  { %v609_v0 = vpop.f32.mrf.mxu2 }
 0x90a   :  { %v610_v26 = vadd.f32 %v688_v63, %v609_v0 }
 0x90c   :  { %v679_v1 = vmul.f32 -1.442695, %v610_v26 }
 0x90e   :  { %689 = vpow2.f32 %v679_v1 }
 0x914   :  { %v690_v2 = vpop.eup %689 }
 0x915   :  { %v615_v3 = vadd.f32 1.0, %v690_v2 }
 0x917   :  { %691 = vrcp.f32 %v615_v3  ;;  %v627_v7 = vand.u32 2147483648, %v615_v3  ;;  %v625_v9 = vand.u32 2147483647, %v615_v3  ;;  %vm621_vm4 = vweird.f32 %v615_v3 }
 0x919   :  { %v628_v11 = vor.u32 1.1754944e-38, %v627_v7  ;;  %vm626_vm7 = vcmp.eq.f32.partialorder %v625_v9, 8.507059e+37 }
 0x91d   :  { %v692_v4 = vpop.eup %691 }
 0x91e   :  { %v617_v5 = vmul.f32 %v692_v4, %v615_v3  ;;  %vm622_vm3 = vweird.f32 %v692_v4 }
 0x91f   :  { %vm623_vm5 = vmor %vm621_vm4, %vm622_vm3 }
 0x920   :  { %v618_v6 = vsub.f32 1.0, %v617_v5 }
 0x922   :  { %v619_v8 = vmul.f32 %v692_v4, %v618_v6 }
 0x924   :  { %v620_v10 = vadd.f32 %v692_v4, %v619_v8 }
 0x926   :  { %v624_v12 = vsel %vm623_vm5, %v692_v4, %v620_v10 }
 0x927   :  { %v629_v13 = vsel %vm626_vm7, %v628_v11, %v624_v12 }
 0x928   :  { %632 = vst.msk [vmem:[%s1079_s19] sm:$0x3] %vm631_vm6, %v629_v13 }
 0x929   :  { %717 = dma.done.wait [#allocation4], 32  }
 0x92a   :  { %718 = vsyncadd [#allocation4], 4294967264 }
 0x92b   :  { %652 = vsyncpa [#allocation4], 1 }

</bundles_post_ra>
